<compile_context>
chip_gen: v7x
topology: tpu7x:2x2x1
jax: 0.10.0
libtpu: 0.0.40
codegen_flags: <defaults>
</compile_context>

<pallas_src>
import functools

import jax
import jax.numpy as jnp
from jax import lax
from jax.experimental import pallas as pl
from jax.experimental.pallas import tpu as pltpu

_LN_EPS = 1e-5


def _round_up(x, m):
    return ((x + m - 1) // m) * m


def _ln_normalize(x, eps=_LN_EPS):
    # One-pass stats: the two cross-lane reductions (mean, mean of squares)
    # are independent instead of serialized through (x - mu).
    mu = jnp.mean(x, axis=-1, keepdims=True)
    m2 = jnp.mean(x * x, axis=-1, keepdims=True)
    var = jnp.maximum(m2 - mu * mu, 0.0)      # guard fp cancellation
    return (x - mu) * lax.rsqrt(var + eps)


def _fused_kernel(x_ref, w1_ref, b1_ref, w2_ref, b2_ref, o_ref, *, mm_dtype):
    x = x_ref[...].astype(jnp.float32)

    # LayerNorm1 (affine folded into w1/b1 by the wrapper) -> Linear1.
    xh = _ln_normalize(x)
    h = jnp.dot(xh.astype(mm_dtype), w1_ref[...],
                preferred_element_type=jnp.float32) + b1_ref[...]

    # LayerNorm2 (affine folded into w2/b2) -> Linear2 (lane-padded output).
    hh = _ln_normalize(h)
    out = jnp.dot(hh.astype(mm_dtype), w2_ref[...],
                  preferred_element_type=jnp.float32) + b2_ref[...]
    o_ref[...] = out.astype(o_ref.dtype)


def iterated_loss_classifier_raw_signal(x, params, *, tile_b=None, use_bf16=True):
    """x: (B, D) float32.  params: dict of LN/Linear parameters (see init_params)."""
    B, D = x.shape
    H = params["w1"].shape[1]
    C = params["w2"].shape[1]

    mm_dtype = jnp.bfloat16 if use_bf16 else jnp.float32
    mm_bytes = jnp.dtype(mm_dtype).itemsize

    # ---- Fold LayerNorm affine transforms into the linear layers ----------
    # (LN(x) * g + beta) @ W + b  ==  LN(x) @ (diag(g) W) + (beta @ W + b)
    w1 = (params["w1"] * params["g1"].reshape(D, 1)).astype(mm_dtype)
    b1 = (params["be1"] @ params["w1"] + params["b1"]).astype(jnp.float32)
    w2f = params["w2"] * params["g2"].reshape(H, 1)
    b2f = (params["be2"] @ params["w2"] + params["b2"]).astype(jnp.float32)

    # ---- Pad classifier output to lane-dense 128-multiple columns ---------
    C_pad = max(128, _round_up(C, 128))
    w2 = jnp.zeros((H, C_pad), jnp.float32).at[:, :C].set(w2f).astype(mm_dtype)
    b2 = jnp.zeros((1, C_pad), jnp.float32).at[:, :C].set(b2f)

    # ---- Choose batch tile -------------------------------------------------
    if tile_b is None:
        if B <= 512:
            tile_b = _round_up(B, 8)          # single grid step for tiny batch
        else:
            tile_b = 512                      # multiple of 128; grid >= 2 -> megacore
    assert tile_b > 0 and tile_b % 8 == 0, "tile_b must be a positive multiple of 8"

    B_pad = _round_up(B, tile_b)
    if B_pad != B:
        x = jnp.zeros((B_pad, D), x.dtype).at[:B, :].set(x)

    grid = (B_pad // tile_b,)
    full = lambda i: (0, 0)  # whole-array block, same every grid step

    cost = pl.CostEstimate(
        flops=2 * B_pad * (D * H + H * C_pad) + 10 * B_pad * (D + H),
        transcendentals=2 * B_pad,
        bytes_accessed=(B_pad * D * 4 + B_pad * C_pad * 4
                        + D * H * mm_bytes + H * C_pad * mm_bytes
                        + (H + C_pad) * 4),
    )

    # Double-buffered x / out tiles + resident weights, with headroom.
    needed = (2 * tile_b * (D + C_pad) * 4
              + (D * H + H * C_pad) * mm_bytes + (H + C_pad) * 4)
    vmem_limit = int(min(max(4 * needed, 16 << 20), 64 << 20))  # <=64MiB (v7x)

    out = pl.pallas_call(
        functools.partial(_fused_kernel, mm_dtype=mm_dtype),
        out_shape=jax.ShapeDtypeStruct((B_pad, C_pad), jnp.float32),
        grid_spec=pltpu.PrefetchScalarGridSpec(
            num_scalar_prefetch=0,
            grid=grid,
            in_specs=[
                pl.BlockSpec((tile_b, D), lambda i: (i, 0)),   # x tile
                pl.BlockSpec((D, H), full),                    # folded W1
                pl.BlockSpec((1, H), full),                    # folded b1
                pl.BlockSpec((H, C_pad), full),                # folded, padded W2
                pl.BlockSpec((1, C_pad), full),                # folded, padded b2
            ],
            out_specs=pl.BlockSpec((tile_b, C_pad), lambda i: (i, 0)),
        ),
        compiler_params=pltpu.CompilerParams(
            dimension_semantics=("parallel",),
            vmem_limit_bytes=vmem_limit),
        cost_estimate=cost,
    )(x, w1, b1, w2, b2)

    return out[:B, :C]


def init_params(key, dim_input_space, num_classes, nb_features_projection=64):
    """Deterministic init mirroring nn.LayerNorm / nn.Linear defaults."""
    k1, k2, k3, k4 = jax.random.split(key, 4)

    def linear_init(kw, kb, fan_in, fan_out):
        bound = 1.0 / jnp.sqrt(fan_in)
        # stored as (fan_in, fan_out) == PyTorch weight.T
        w = jax.random.uniform(kw, (fan_in, fan_out), jnp.float32, -bound, bound)
        b = jax.random.uniform(kb, (1, fan_out), jnp.float32, -bound, bound)
        return w, b

    w1, b1 = linear_init(k1, k2, dim_input_space, nb_features_projection)
    w2, b2 = linear_init(k3, k4, nb_features_projection, num_classes)
    return {
        "g1": jnp.ones((1, dim_input_space), jnp.float32),
        "be1": jnp.zeros((1, dim_input_space), jnp.float32),
        "w1": w1, "b1": b1,
        "g2": jnp.ones((1, nb_features_projection), jnp.float32),
        "be2": jnp.zeros((1, nb_features_projection), jnp.float32),
        "w2": w2, "b2": b2,
    }


def reference_forward(x, p):
    """Pure f32 JAX reference matching the PyTorch module exactly."""
    def ln(v, g, b):
        mu = jnp.mean(v, axis=-1, keepdims=True)
        var = jnp.mean((v - mu) * (v - mu), axis=-1, keepdims=True)
        return (v - mu) / jnp.sqrt(var + _LN_EPS) * g + b

    h = ln(x, p["g1"], p["be1"]) @ p["w1"] + p["b1"]
    return ln(h, p["g2"], p["be2"]) @ p["w2"] + p["b2"]


if __name__ == "__main__":
    dim_input_space = 128   # raw-signal feature dimension
    num_classes = 10
    batch = 16

    key = jax.random.PRNGKey(0)
    kx, kp = jax.random.split(key)
    x = jax.random.normal(kx, (batch, dim_input_space), jnp.float32)
    params = init_params(kp, dim_input_space, num_classes)

    ref = reference_forward(x, params)

    # f32-MXU path: strict comparison against the PyTorch-precision reference.
    out_f32 = jax.block_until_ready(
        iterated_loss_classifier_raw_signal(x, params, use_bf16=False))
    assert out_f32.shape == (batch, num_classes)
    assert jnp.allclose(out_f32, ref, atol=1e-4, rtol=1e-4), "f32 mismatch vs reference"

    # bf16-MXU path (v6e/v7x fast path, f32 accumulation): looser tolerance.
    out_bf16 = jax.block_until_ready(
        iterated_loss_classifier_raw_signal(x, params, use_bf16=True))
    assert out_bf16.shape == (batch, num_classes)
    assert jnp.allclose(out_bf16, ref, atol=1e-1, rtol=1e-1), "bf16 mismatch vs reference"

    print("KERNEL_OK")
</pallas_src>

<mosaic_0001>
module attributes {stable_mosaic.version = 11 : i64} {
  func.func @_fused_kernel(%arg0: i32, %arg1: memref<16x128xf32, #tpu.memory_space<vmem>>, %arg2: memref<128x64xf32, #tpu.memory_space<vmem>>, %arg3: memref<1x64xf32, #tpu.memory_space<vmem>>, %arg4: memref<64x128xf32, #tpu.memory_space<vmem>>, %arg5: memref<1x128xf32, #tpu.memory_space<vmem>>, %arg6: memref<16x128xf32, #tpu.memory_space<vmem>>) attributes {dimension_semantics = [#tpu.dimension_semantics<parallel>], iteration_bounds = array<i64: 1>, scalar_prefetch = 0 : i64, scratch_operands = 0 : i64, tpu.core_type = #tpu.core_type<tc>, window_params = [{transform_indices = @transform_0, window_bounds = array<i64: 16, 128>}, {pipeline_mode = #tpu.pipeline_mode<synchronous>, transform_indices = @transform_1, window_bounds = array<i64: 128, 64>}, {pipeline_mode = #tpu.pipeline_mode<synchronous>, transform_indices = @transform_2, window_bounds = array<i64: 1, 64>}, {pipeline_mode = #tpu.pipeline_mode<synchronous>, transform_indices = @transform_3, window_bounds = array<i64: 64, 128>}, {pipeline_mode = #tpu.pipeline_mode<synchronous>, transform_indices = @transform_4, window_bounds = array<i64: 1, 128>}, {transform_indices = @transform_5, window_bounds = array<i64: 16, 128>}]} {
    %c0 = arith.constant 0 : index
    %c0_0 = arith.constant 0 : index
    %0 = vector.load %arg1[%c0, %c0_0] : memref<16x128xf32, #tpu.memory_space<vmem>>, vector<16x128xf32>
    %cst = arith.constant dense<0.000000e+00> : vector<16xf32>
    %1 = vector.multi_reduction <add>, %0, %cst [1] : vector<16x128xf32> to vector<16xf32>
    %2 = vector.shape_cast %1 : vector<16xf32> to vector<16x1xf32>
    %cst_1 = arith.constant 1.280000e+02 : f32
    %3 = vector.broadcast %cst_1 : f32 to vector<16x1xf32>
    %4 = arith.divf %2, %3 : vector<16x1xf32>
    %5 = arith.mulf %0, %0 : vector<16x128xf32>
    %cst_2 = arith.constant dense<0.000000e+00> : vector<16xf32>
    %6 = vector.multi_reduction <add>, %5, %cst_2 [1] : vector<16x128xf32> to vector<16xf32>
    %7 = vector.shape_cast %6 : vector<16xf32> to vector<16x1xf32>
    %cst_3 = arith.constant 1.280000e+02 : f32
    %8 = vector.broadcast %cst_3 : f32 to vector<16x1xf32>
    %9 = arith.divf %7, %8 : vector<16x1xf32>
    %10 = arith.mulf %4, %4 : vector<16x1xf32>
    %11 = arith.subf %9, %10 : vector<16x1xf32>
    %cst_4 = arith.constant 0.000000e+00 : f32
    %12 = vector.broadcast %cst_4 : f32 to vector<16x1xf32>
    %13 = arith.maximumf %11, %12 : vector<16x1xf32>
    %14 = vector.broadcast %4 : vector<16x1xf32> to vector<16x128xf32>
    %15 = arith.subf %0, %14 : vector<16x128xf32>
    %cst_5 = arith.constant 9.99999974E-6 : f32
    %16 = vector.broadcast %cst_5 : f32 to vector<16x1xf32>
    %17 = arith.addf %13, %16 : vector<16x1xf32>
    %18 = math.rsqrt %17 : vector<16x1xf32>
    %19 = vector.broadcast %18 : vector<16x1xf32> to vector<16x128xf32>
    %20 = arith.mulf %15, %19 : vector<16x128xf32>
    %c0_6 = arith.constant 0 : index
    %c0_7 = arith.constant 0 : index
    %21 = vector.load %arg2[%c0_6, %c0_7] : memref<128x64xf32, #tpu.memory_space<vmem>>, vector<128x64xf32>
    %cst_8 = arith.constant dense<0.000000e+00> : vector<16x64xf32>
    %22 = tpu.matmul %20, %21, %cst_8 {dimension_numbers = #tpu.dot_dimension_numbers<[1], [0], [0], [1], [0, 0, 1, 1], [], []>} : vector<16x128xf32>, vector<128x64xf32>, vector<16x64xf32> -> vector<16x64xf32>
    %c0_9 = arith.constant 0 : index
    %c0_10 = arith.constant 0 : index
    %23 = vector.load %arg3[%c0_9, %c0_10] : memref<1x64xf32, #tpu.memory_space<vmem>>, vector<1x64xf32>
    %24 = vector.broadcast %23 : vector<1x64xf32> to vector<16x64xf32>
    %25 = arith.addf %22, %24 : vector<16x64xf32>
    %cst_11 = arith.constant dense<0.000000e+00> : vector<16xf32>
    %26 = vector.multi_reduction <add>, %25, %cst_11 [1] : vector<16x64xf32> to vector<16xf32>
    %27 = vector.shape_cast %26 : vector<16xf32> to vector<16x1xf32>
    %cst_12 = arith.constant 6.400000e+01 : f32
    %28 = vector.broadcast %cst_12 : f32 to vector<16x1xf32>
    %29 = arith.divf %27, %28 : vector<16x1xf32>
    %30 = arith.mulf %25, %25 : vector<16x64xf32>
    %cst_13 = arith.constant dense<0.000000e+00> : vector<16xf32>
    %31 = vector.multi_reduction <add>, %30, %cst_13 [1] : vector<16x64xf32> to vector<16xf32>
    %32 = vector.shape_cast %31 : vector<16xf32> to vector<16x1xf32>
    %cst_14 = arith.constant 6.400000e+01 : f32
    %33 = vector.broadcast %cst_14 : f32 to vector<16x1xf32>
    %34 = arith.divf %32, %33 : vector<16x1xf32>
    %35 = arith.mulf %29, %29 : vector<16x1xf32>
    %36 = arith.subf %34, %35 : vector<16x1xf32>
    %cst_15 = arith.constant 0.000000e+00 : f32
    %37 = vector.broadcast %cst_15 : f32 to vector<16x1xf32>
    %38 = arith.maximumf %36, %37 : vector<16x1xf32>
    %39 = vector.broadcast %29 : vector<16x1xf32> to vector<16x64xf32>
    %40 = arith.subf %25, %39 : vector<16x64xf32>
    %cst_16 = arith.constant 9.99999974E-6 : f32
    %41 = vector.broadcast %cst_16 : f32 to vector<16x1xf32>
    %42 = arith.addf %38, %41 : vector<16x1xf32>
    %43 = math.rsqrt %42 : vector<16x1xf32>
    %44 = vector.broadcast %43 : vector<16x1xf32> to vector<16x64xf32>
    %45 = arith.mulf %40, %44 : vector<16x64xf32>
    %c0_17 = arith.constant 0 : index
    %c0_18 = arith.constant 0 : index
    %46 = vector.load %arg4[%c0_17, %c0_18] : memref<64x128xf32, #tpu.memory_space<vmem>>, vector<64x128xf32>
    %cst_19 = arith.constant dense<0.000000e+00> : vector<16x128xf32>
    %47 = tpu.matmul %45, %46, %cst_19 {dimension_numbers = #tpu.dot_dimension_numbers<[1], [0], [0], [1], [0, 0, 1, 1], [], []>} : vector<16x64xf32>, vector<64x128xf32>, vector<16x128xf32> -> vector<16x128xf32>
    %c0_20 = arith.constant 0 : index
    %c0_21 = arith.constant 0 : index
    %48 = vector.load %arg5[%c0_20, %c0_21] : memref<1x128xf32, #tpu.memory_space<vmem>>, vector<1x128xf32>
    %49 = vector.broadcast %48 : vector<1x128xf32> to vector<16x128xf32>
    %50 = arith.addf %47, %49 : vector<16x128xf32>
    %c0_22 = arith.constant 0 : index
    %c0_23 = arith.constant 0 : index
    %51 = vector.load %arg6[%c0_22, %c0_23] : memref<16x128xf32, #tpu.memory_space<vmem>>, vector<16x128xf32>
    tpu.vector_store %arg6[%c0_22, %c0_23], %50 {strides = array<i32>} : memref<16x128xf32, #tpu.memory_space<vmem>>, vector<16x128xf32>,
    return
  }
  func.func @transform_0(%arg0: i32) -> (i32, i32) {
    %c0_i32 = arith.constant 0 : i32
    %c0_i32_0 = arith.constant 0 : i32
    return %arg0, %c0_i32 : i32, i32
  }
  func.func @transform_1(%arg0: i32) -> (i32, i32) {
    %c0_i32 = arith.constant 0 : i32
    %c0_i32_0 = arith.constant 0 : i32
    %c0_i32_1 = arith.constant 0 : i32
    return %c0_i32, %c0_i32_0 : i32, i32
  }
  func.func @transform_2(%arg0: i32) -> (i32, i32) {
    %c0_i32 = arith.constant 0 : i32
    %c0_i32_0 = arith.constant 0 : i32
    %c0_i32_1 = arith.constant 0 : i32
    return %c0_i32, %c0_i32_0 : i32, i32
  }
  func.func @transform_3(%arg0: i32) -> (i32, i32) {
    %c0_i32 = arith.constant 0 : i32
    %c0_i32_0 = arith.constant 0 : i32
    %c0_i32_1 = arith.constant 0 : i32
    return %c0_i32, %c0_i32_0 : i32, i32
  }
  func.func @transform_4(%arg0: i32) -> (i32, i32) {
    %c0_i32 = arith.constant 0 : i32
    %c0_i32_0 = arith.constant 0 : i32
    %c0_i32_1 = arith.constant 0 : i32
    return %c0_i32, %c0_i32_0 : i32, i32
  }
  func.func @transform_5(%arg0: i32) -> (i32, i32) {
    %c0_i32 = arith.constant 0 : i32
    %c0_i32_0 = arith.constant 0 : i32
    return %arg0, %c0_i32 : i32, i32
  }
}

</mosaic_0001>

<bundles_post_ra>
// kernel: tpu_custom_call.1
= control target key start
LH: loop header
LB: loop body
LE: loop exit
PB: predicated region body
PF: predicated region fallthrough
CT: control target
= control target key end

     0   :  { %s614_s0 = inlined_call_operand.vmem [shape: f32[16,128], index: 0, kind: input, shape index: {}]   ;;  %s615_s1 = inlined_call_operand.vmem [shape: f32[128,64], index: 1, kind: input, shape index: {}]   ;;  %s616_s2 = inlined_call_operand.vmem [shape: f32[1,64], index: 2, kind: input, shape index: {}]   ;;  %s617_s3 = inlined_call_operand.vmem [shape: f32[64,128], index: 3, kind: input, shape index: {}]   ;;  %s618_s4 = inlined_call_operand.vmem [shape: f32[1,128], index: 4, kind: input, shape index: {}]   ;;  %s619_s5 = inlined_call_operand.hbm [shape: f32[16,128], index: 5, kind: output, shape index: {}]  }
   0x1   :  { %v503_v0 = vld [vmem:[%s614_s0] sm:$0xff]  ;;  %v508_v1 = vld [vmem:[%s614_s0 + $0x8] sm:$0xff]  ;;  %v54_v5 = vld [vmem:[%s615_s1 + $0x10] sm:$0xff] }
   0x2   :  { %v52_v2 = vld [vmem:[%s615_s1] sm:$0xff]  ;;  %23 = vadd.xlane.f32.xlu0 %v503_v0  ;;  %v30_v3 = vmul.f32 %v503_v0, %v503_v0  ;;  %v53_v4 = vld [vmem:[%s615_s1 + $0x8] sm:$0xff]  ;;  %v55_v6 = vld [vmem:[%s615_s1 + $0x18] sm:$0xff] }
   0x3   :  { %v384_v7 = vpack.c.bf16 %v53_v4, %v52_v2  ;;  %v388_v8 = vpack.c.bf16 %v55_v6, %v54_v5 }
   0x4   :  { %10 = vsyncpa [#allocation3], 0  ;;  %32 = vadd.xlane.f32.xlu1 %v30_v3  ;;  %v31_v9 = vmul.f32 %v508_v1, %v508_v1  ;;  %v56_v10 = vld [vmem:[%s615_s1 + $0x20] sm:$0xff]  ;;  %v57_v11 = vld [vmem:[%s615_s1 + $0x28] sm:$0xff]  ;;  %vm150_vm0 = vcmask 523264   ;;  %s467_s19 = smov [#allocation2]  }
   0x5   :  { %385 = vmatprep.subr.bf16.mxu0 %v384_v7  ;;  %v392_v12 = vpack.c.bf16 %v57_v11, %v56_v10  ;;  %v58_v13 = vld [vmem:[%s615_s1 + $0x30] sm:$0xff]  ;;  %v59_v14 = vld [vmem:[%s615_s1 + $0x38] sm:$0xff]  ;;  %v60_v16 = vld [vmem:[%s615_s1 + $0x40] sm:$0xff]  ;;  %s287_s20 = sshll.u32 %s467_s19, 4  ;;  %s288_s20 = int_to_ptr.vmem [resolvable:$true] %s287_s20 }
   0x6   :  { %25 = vadd.xlane.f32.xlu0 %v508_v1  ;;  %387 = vmatpush3.bf16.msra.mxu0 %v384_v7  ;;  %v396_v15 = vpack.c.bf16 %v59_v14, %v58_v13  ;;  %v61_v17 = vld [vmem:[%s615_s1 + $0x48] sm:$0xff]  ;;  %v62_v19 = vld [vmem:[%s615_s1 + $0x50] sm:$0xff]  ;;  %v63_v20 = vld [vmem:[%s615_s1 + $0x58] sm:$0xff]  ;;  %s443_s21 = scalar_lea.vmem %s288_s20, 256  ;;  %p448_p1 = scmp.lt.s32.totalorder %s288_s20, %s288_s20 }
   0x7   :  { %389 = vmatprep.subr.bf16.mxu0 %v388_v8  ;;  %v400_v18 = vpack.c.bf16 %v61_v17, %v60_v16  ;;  %v404_v21 = vpack.c.bf16 %v63_v20, %v62_v19  ;;  %v64_v22 = vld [vmem:[%s615_s1 + $0x60] sm:$0xff]  ;;  %v65_v23 = vld [vmem:[%s615_s1 + $0x68] sm:$0xff]  ;;  %v66_v24 = vld [vmem:[%s615_s1 + $0x70] sm:$0xff]  ;;  %p444_p0 = scmp.ne.s32.totalorder %s288_s20, %s443_s21  ;;  %p449_p2 = scmp.lt.s32.totalorder %s443_s21, %s443_s21 }
   0x8   :  { %34 = vadd.xlane.f32.xlu1 %v31_v9  ;;  %v408_v25 = vpack.c.bf16 %v65_v23, %v64_v22  ;;  %v67_v26 = vld [vmem:[%s615_s1 + $0x78] sm:$0xff]  ;;  %v298_v50 = vld [vmem:[%s616_s2] ss:$0 sm:$0xff]  ;;  %v185_v62 = vld [vmem:[%s617_s3 + $0x8] sm:$0xff] }
   0x9   :  { %v412_v27 = vpack.c.bf16 %v67_v26, %v66_v24  ;;  %v184_v61 = vld [vmem:[%s617_s3] sm:$0xff]  ;;  %v189_v4 = vld [vmem:[%s617_s3 + $0x28] sm:$0xff]  ;;  %v190_v6 = vld [vmem:[%s617_s3 + $0x30] sm:$0xff]  ;;  %p450_p3 = por %p449_p2, %p448_p1 }
   0xa   :  { %391 = vmatpush3.bf16.msra.mxu0 %v388_v8  ;;  %v416_v63 = vpack.c.bf16 %v185_v62, %v184_v61  ;;  %v188_v3 = vld [vmem:[%s617_s3 + $0x20] sm:$0xff]  ;;  %v191_v7 = vld [vmem:[%s617_s3 + $0x38] sm:$0xff] }
   0xb   :  { %393 = vmatprep.subr.bf16.mxu0 %v392_v12  ;;  %v424_v5 = vpack.c.bf16 %v189_v4, %v188_v3  ;;  %v428_v8 = vpack.c.bf16 %v191_v7, %v190_v6  ;;  %p451_p4 = pnand %p450_p3, %p444_p0 }
   0xc   :  { %417 = vmatprep.subr.bf16.mxu1 %v416_v63 }
   0xd   :  { %419 = vmatpush3.bf16.msra.mxu1 %v416_v63 }
   0xe   :  { %395 = vmatpush3.bf16.msra.mxu0 %v392_v12 }
   0xf   :  { %397 = vmatprep.subr.bf16.mxu0 %v396_v15 }
  0x12   :  { %399 = vmatpush3.bf16.msra.mxu0 %v396_v15 }
  0x13   :  { %401 = vmatprep.subr.bf16.mxu0 %v400_v18 }
  0x16   :  { %403 = vmatpush3.bf16.msra.mxu0 %v400_v18 }
  0x17   :  { %405 = vmatprep.subr.bf16.mxu0 %v404_v21 }
  0x1a   :  { %407 = vmatpush3.bf16.msra.mxu0 %v404_v21 }
  0x1b   :  { %409 = vmatprep.subr.bf16.mxu0 %v408_v25 }
  0x1e   :  { %411 = vmatpush3.bf16.msra.mxu0 %v408_v25 }
  0x1f   :  { %413 = vmatprep.subr.bf16.mxu0 %v412_v27 }
  0x22   :  { %415 = vmatpush3.bf16.msra.mxu0 %v412_v27 }
  0x8f   :  { %v24_v28 = vpop.xlane.xlu0 %23 }
  0x90   :  { %v28_v29 = vmul.f32 0.0078125, %v24_v28 }
  0x91   :  { %v33_v30 = vpop.xlane.xlu1 %32 }
  0x92   :  { %v38_v31 = vmul.f32 %v28_v29, %v28_v29  ;;  %v36_v32 = vmul.f32 0.0078125, %v33_v30  ;;  %v44_v44 = vsub.f32 %v503_v0, %v28_v29  ;;  %v186_v0 = vld [vmem:[%s617_s3 + $0x10] sm:$0xff] }
  0x93   :  { %v26_v33 = vpop.xlane.xlu0 %25 }
  0x94   :  { %v40_v34 = vsub.f32 %v36_v32, %v38_v31  ;;  %v29_v35 = vmul.f32 0.0078125, %v26_v33  ;;  %v299_v31 = vld [vmem:[%s618_s4] ss:$0 sm:$0xff] }
  0x95   :  { %v35_v36 = vpop.xlane.xlu1 %34 }
  0x96   :  { %v42_v37 = vmax.f32 %v40_v34, 0.0  ;;  %v39_v38 = vmul.f32 %v29_v35, %v29_v35  ;;  %v37_v39 = vmul.f32 0.0078125, %v35_v36  ;;  %v45_v47 = vsub.f32 %v508_v1, %v29_v35  ;;  %v187_v1 = vld [vmem:[%s617_s3 + $0x18] sm:$0xff] }
  0x97   :  { %v420_v2 = vpack.c.bf16 %v187_v1, %v186_v0 }
  0x98   :  { %v46_v40 = vadd.f32 1e-05, %v42_v37  ;;  %v41_v41 = vsub.f32 %v37_v39, %v39_v38 }
  0x99   :  { %421 = vmatprep.subr.bf16.mxu1 %v420_v2 }
  0x9a   :  { %435 = vrsqrt.f32 %v46_v40  ;;  %v43_v42 = vmax.f32 %v41_v41, 0.0  ;;  %423 = vmatpush3.bf16.msra.mxu1 %v420_v2 }
  0x9b   :  { %425 = vmatprep.subr.bf16.mxu1 %v424_v5 }
  0x9c   :  { %v47_v43 = vadd.f32 1e-05, %v43_v42 }
  0x9e   :  { %437 = vrsqrt.f32 %v47_v43  ;;  %427 = vmatpush3.bf16.msra.mxu1 %v424_v5 }
  0x9f   :  { %429 = vmatprep.subr.bf16.mxu1 %v428_v8 }
  0xa2   :  { %431 = vmatpush3.bf16.msra.mxu1 %v428_v8 }
  0xa4   :  { %v436_v45 = vpop.eup %435 }
  0xa5   :  { %v50_v46 = vmul.f32 %v436_v45, %v44_v44 }
  0xa7   :  { %362 = vmatprep.mubr.f32.mxu0 %v50_v46 }
  0xa8   :  { %v438_v48 = vpop.eup %437 }
  0xa9   :  { %v51_v49 = vmul.f32 %v438_v48, %v45_v47 }
  0xab   :  { %363 = vmatmul.mubr.f32.vlgmr.msra.gmra.mrb[0].mxu0 %v51_v49 }
 0x17e   :  { %v364_v51 = vpop.f32.mrb[0].mxu0 }
 0x17f   :  { %v147_v52 = vadd.f32 %v364_v51, %v298_v50  ;;  %v141_v53 = vpop.f32.mrb[1].mxu0 }
 0x180   :  { %v142_v54 = vadd.f32 %v298_v50, %v141_v53 }
 0x181   :  { %v154_v55 = vsel %vm150_vm0, %v147_v52, 0.0  ;;  %v161_v56 = vmul.f32 %v147_v52, %v147_v52 }
 0x182   :  { %155 = vadd.xlane.f32.xlu1 %v154_v55  ;;  %v151_v57 = vsel %vm150_vm0, %v142_v54, 0.0  ;;  %v160_v58 = vmul.f32 %v142_v54, %v142_v54 }
 0x183   :  { %152 = vadd.xlane.f32.xlu0 %v151_v57  ;;  %v165_v59 = vsel %vm150_vm0, %v161_v56, 0.0 }
 0x184   :  { %v162_v60 = vsel %vm150_vm0, %v160_v58, 0.0 }
 0x186   :  { %166 = vadd.xlane.f32.xlu1 %v165_v59 }
 0x187   :  { %163 = vadd.xlane.f32.xlu0 %v162_v60 }
 0x20f   :  { %v156_v9 = vpop.xlane.xlu1 %155 }
 0x210   :  { %v159_v10 = vmul.f32 0.015625, %v156_v9  ;;  %v153_v11 = vpop.xlane.xlu0 %152 }
 0x211   :  { %v158_v12 = vmul.f32 0.015625, %v153_v11 }
 0x212   :  { %v171_v14 = vmul.f32 %v159_v10, %v159_v10  ;;  %v177_v28 = vsub.f32 %v147_v52, %v159_v10 }
 0x213   :  { %v167_v13 = vpop.xlane.xlu1 %166  ;;  %v170_v17 = vmul.f32 %v158_v12, %v158_v12  ;;  %v176_v26 = vsub.f32 %v142_v54, %v158_v12 }
 0x214   :  { %v169_v15 = vmul.f32 0.015625, %v167_v13  ;;  %v164_v16 = vpop.xlane.xlu0 %163 }
 0x215   :  { %v168_v18 = vmul.f32 0.015625, %v164_v16 }
 0x216   :  { %v173_v19 = vsub.f32 %v169_v15, %v171_v14 }
 0x217   :  { %v172_v20 = vsub.f32 %v168_v18, %v170_v17 }
 0x218   :  { %v175_v21 = vmax.f32 %v173_v19, 0.0 }
 0x219   :  { %v174_v22 = vmax.f32 %v172_v20, 0.0 }
 0x21a   :  { %v179_v23 = vadd.f32 1e-05, %v175_v21 }
 0x21b   :  { %v178_v24 = vadd.f32 1e-05, %v174_v22 }
 0x21c   :  { %439 = vrsqrt.f32 %v179_v23 }
 0x21d   :  { %441 = vrsqrt.f32 %v178_v24 }
 0x226   :  { %v440_v25 = vpop.eup %439 }
 0x227   :  { %v442_v27 = vpop.eup %441  ;;  %v183_v30 = vmul.f32 %v440_v25, %v177_v28 }
 0x228   :  { %v182_v29 = vmul.f32 %v442_v27, %v176_v26 }
 0x22a   :  { %381 = vmatprep.mubr.msk.f32.mxu1 %vm150_vm0, %v182_v29 }
 0x22b   :  { %382 = vmatmul.mubr.msk.f32.vlgmr.msra.gmra.mrb[0].mxu1 %vm150_vm0, %v183_v30 }
 0x2fe   :  { %v383_v32 = vpop.f32.mrb[0].mxu1 }
 0x2ff   :  { %v277_v33 = vadd.f32 %v383_v32, %v299_v31  ;;  %v271_v34 = vpop.f32.mrb[1].mxu1 }
 0x300   :  { %v272_v35 = vadd.f32 %v299_v31, %v271_v34 }
 0x301   :  { %281 = vst [vmem:[#allocation2 + $0x8] sm:$0xff] %v277_v33 }
 0x302   :  { %280 = vst [vmem:[#allocation2] sm:$0xff] %v272_v35 }
 0x303   :  { %454 = shalt.err (!%p451_p4)
}
 0x304   :  { %s455_s4 = scalar_lea.hbm %s619_s5, 256 }
 0x305   :  { %p456_p5 = scmp.ne.s32.totalorder %s619_s5, %s455_s4  ;;  %p459_p6 = scmp.lt.u32.totalorder %s455_s4, %s619_s5 }
 0x307   :  { %p461_p7 = pnand %p459_p6, %p456_p5 }
 0x309   :  { %464 = shalt.err (!%p461_p7)
}
 0x30a   :  { %s468_s1 = smov 128   ;;  %s469_s28 = smov 8  }
 0x30b   :  { %293 = dma.vmem_to_hbm [thread:$0]  %s288_s20, 256, %s619_s5, [#allocation3], %s468_s1, %s468_s1, %s469_s28  }
 0x30c   :  { %465 = dma.done.wait [#allocation3], 256  }
 0x30d   :  { %466 = vsyncadd [#allocation3], 4294967040 }
 0x30e   :  { %297 = vsyncpa [#allocation3], 1 }

</bundles_post_ra>
